<compile_context>
chip_gen: v6e
topology: v6e:2x2x1
jax: 0.10.0
libtpu: 0.0.40
codegen_flags: <defaults>
</compile_context>

<pallas_src>
import functools

import numpy as np
import jax
import jax.numpy as jnp
from jax.experimental import pallas as pl
from jax.experimental.pallas import tpu as pltpu


# ---------------------------------------------------------------------------
# Fused kernel: whole forward pass for one batch tile, entirely in VMEM.
# ---------------------------------------------------------------------------
def _fused_convnet_kernel(xr_ref, t1_ref, b1_ref, t2_ref, b2_ref, g_ref, b3_ref,
                          o_ref, *, H, W):
    """One grid step = one batch tile.

    xr_ref : (bt, 2, H//2, W)      row-parity packed input (p = row % 2)
    t1_ref : (3, W, (W-2)*8)       conv1 tap-row ki as a banded width matmul
    b1_ref : (1, (W-2)*8)          conv1 bias tiled over output columns
    t2_ref : (3, (W-2)*8, ow2*16)  conv2 (stride 2) tap-row ki, banded
    b2_ref : (1, ow2*16)           conv2 bias tiled over output columns
    g_ref  : (ow2*16, 6)           global-avg-pool + 1x1 conv3 fused
    b3_ref : (1, 6)
    o_ref  : (bt, 1, 6)

    Activations keep (column, channel) flattened on the lane axis, so every
    access below is a contiguous slice and every contraction is a plain 2-D
    MXU matmul (no batched dots, no weight broadcasts, no gathers).
    """
    f32 = jnp.float32
    bt = xr_ref.shape[0]
    oh1, ow1 = H - 2, W - 2
    n1 = oh1 // 2                                   # conv1 rows per row-parity
    oh2, ow2 = (oh1 - 3) // 2 + 1, (ow1 - 3) // 2 + 1

    # ---- conv1 (1 -> 8) + ReLU, even / odd output rows separately ---------
    y1 = []
    for q in (0, 1):                                # conv1 output-row parity
        acc = None
        for ki in range(3):
            p, d = (q + ki) % 2, (q + ki) // 2      # input row parity / offset
            lhs = xr_ref[:, p, d:d + n1, :].reshape(bt * n1, W)
            part = jnp.dot(lhs, t1_ref[ki], preferred_element_type=f32)
            acc = part if acc is None else acc + part
        y1.append(jnp.maximum(acc + b1_ref[...], 0.0).reshape(bt, n1, ow1 * 8))

    # ---- conv2 (8 -> 16, stride 2) + ReLU: three non-batched MXU matmuls --
    acc2 = None
    for ki in range(3):
        lhs = y1[ki % 2][:, ki // 2:ki // 2 + oh2, :].reshape(bt * oh2, ow1 * 8)
        part = jnp.dot(lhs, t2_ref[ki], preferred_element_type=f32)
        acc2 = part if acc2 is None else acc2 + part
    y2 = jnp.maximum(acc2 + b2_ref[...], 0.0)       # (bt*oh2, ow2*16)

    # ---- global average pool + 1x1 conv3 (pool scale folded into g) -------
    rowsum = jnp.sum(y2.reshape(bt, oh2, ow2 * 16), axis=1)        # (bt, ow2*16)
    out = jnp.dot(rowsum, g_ref[...], preferred_element_type=f32) + b3_ref[...]
    o_ref[...] = out.reshape(bt, 1, 6)


# ---------------------------------------------------------------------------
# Generation-aware tiling helpers
# ---------------------------------------------------------------------------
def _tensorcores_per_chip():
    """Grid-visible TensorCores per chip: 2 on megacore parts (v7x/v4/v5p)."""
    try:
        kind = jax.devices()[0].device_kind.lower().replace(" ", "")
    except Exception:
        return 1
    if "v5lite" in kind or "v5e" in kind or "v6" in kind:
        return 1
    if "v4" in kind or "v5p" in kind or "7" in kind:
        return 2
    return 1


def _step_vmem_bytes(bt, H, W):
    """Rough per-grid-step VMEM footprint (inputs/outputs double-buffered)."""
    Hh = H // 2
    oh1, ow1 = H - 2, W - 2
    oh2, ow2 = (oh1 - 3) // 2 + 1, (ow1 - 3) // 2 + 1
    n1 = oh1 // 2
    inp = bt * 2 * Hh * W * 4
    wts = (3 * W * ow1 * 8 + ow1 * 8 + 3 * ow1 * 8 * ow2 * 16
           + ow2 * 16 + ow2 * 16 * 6 + 6) * 4
    out = bt * 6 * 4
    inter = (2 * bt * n1 * ow1 * 8 + 2 * bt * oh2 * ow2 * 16 + bt * ow2 * 16) * 4
    return 2 * (inp + wts + out) + inter


# ---------------------------------------------------------------------------
# Forward pass wrapper
# ---------------------------------------------------------------------------
def too_simple_convnet_forward(x, packed_params, input_height, input_width):
    t1, b1t, t2, b2t, g, b3 = packed_params
    H, W = int(input_height), int(input_width)
    if not (H == W and H % 2 == 0 and H >= 6):
        # TODO(synk): odd / non-square inputs (torch then avg-pools with an
        # HxH kernel, which is not a global mean) are not handled.
        raise NotImplementedError("kernel assumes even, square inputs >= 6")

    x = x.reshape(-1, 1, H, W).astype(jnp.float32)      # torch .view semantics
    B = x.shape[0]
    Hh = H // 2

    # Row-parity pack (single reshape+transpose): xr[b, p, h, :] = x[b, 2h+p, :]
    # so every stride-2 row access inside the kernel is a contiguous slice.
    xr = x.reshape(B, Hh, 2, W).transpose(0, 2, 1, 3)   # (B, 2, Hh, W)

    # Batch tiling: single-TC chips (v5e/v6e) get ONE grid step (no per-step
    # overhead); megacore chips (v7x) get n_blocks = 2 so both TCs have work.
    # A VMEM budget caps bt when H scales up.
    num_tc = _tensorcores_per_chip()
    preferred_bt = B // num_tc if (num_tc > 1 and B % num_tc == 0) else B
    budget = 16 * 1024 * 1024
    bt = 1
    for d in range(preferred_bt, 0, -1):
        if B % d == 0 and _step_vmem_bytes(d, H, W) <= budget:
            bt = d
            break
    n_blocks = B // bt
    vmem_limit = int(min(48 * 1024 * 1024,
                         max(8 * 1024 * 1024, 2 * _step_vmem_bytes(bt, H, W))))

    kernel = functools.partial(_fused_convnet_kernel, H=H, W=W)

    out = pl.pallas_call(
        kernel,
        out_shape=jax.ShapeDtypeStruct((B, 1, 6), jnp.float32),
        grid=(n_blocks,),
        in_specs=[
            pl.BlockSpec((bt, 2, Hh, W), lambda b: (b, 0, 0, 0)),
            pl.BlockSpec(t1.shape, lambda b: (0, 0, 0)),
            pl.BlockSpec(b1t.shape, lambda b: (0, 0)),
            pl.BlockSpec(t2.shape, lambda b: (0, 0, 0)),
            pl.BlockSpec(b2t.shape, lambda b: (0, 0)),
            pl.BlockSpec(g.shape, lambda b: (0, 0)),
            pl.BlockSpec(b3.shape, lambda b: (0, 0)),
        ],
        out_specs=pl.BlockSpec((bt, 1, 6), lambda b: (b, 0, 0)),
        compiler_params=pltpu.CompilerParams(
            dimension_semantics=("parallel",),
            vmem_limit_bytes=vmem_limit),
    )(xr, t1, b1t, t2, b2t, g, b3)
    return out[:, 0, :]


# ---------------------------------------------------------------------------
# Parameters: deterministic synthetic init (torch layouts) + kernel repacking
# ---------------------------------------------------------------------------
def init_params(key):
    """Deterministic synthetic parameters in the torch Conv2d layouts."""
    k1, k2, k3, k4, k5, k6 = jax.random.split(key, 6)
    w1 = jax.random.normal(k1, (8, 1, 3, 3), jnp.float32) * 0.2   # (OC,IC,KH,KW)
    b1 = jax.random.normal(k2, (8,), jnp.float32) * 0.1
    w2 = jax.random.normal(k3, (16, 8, 3, 3), jnp.float32) * 0.1
    b2 = jax.random.normal(k4, (16,), jnp.float32) * 0.1
    w3 = jax.random.normal(k5, (6, 16, 1, 1), jnp.float32) * 0.1
    b3 = jax.random.normal(k6, (6,), jnp.float32) * 0.1
    return (w1, b1, w2, b2, w3, b3)


def pack_params(torch_params, input_height, input_width):
    """Repack torch-layout conv weights into the kernel's matmul operands."""
    w1, b1, w2, b2, w3, b3 = [np.asarray(p, np.float32) for p in torch_params]
    H, W = int(input_height), int(input_width)
    oh1, ow1 = H - 2, W - 2
    oh2, ow2 = (oh1 - 3) // 2 + 1, (ow1 - 3) // 2 + 1

    # conv1 tap-row ki as a banded (W -> ow1*8) matmul over the width axis:
    #   t1[ki, c+kj, c*8+oc] = w1[oc, 0, ki, kj]
    t1 = np.zeros((3, W, ow1 * 8), np.float32)
    for ki in range(3):
        for c in range(ow1):
            for kj in range(3):
                t1[ki, c + kj, c * 8:(c + 1) * 8] = w1[:, 0, ki, kj]

    # conv2 (stride 2) tap-row ki as a banded (ow1*8 -> ow2*16) matmul:
    #   t2[ki, (2j+kj)*8+ic, j*16+oc] = w2[oc, ic, ki, kj]
    # TODO(synk): t2 is O(W^2) bytes; for very large W switch conv2 to an
    # in-kernel im2col (bt*oh2*ow2, 72) x (72, 16) matmul instead.
    t2 = np.zeros((3, ow1 * 8, ow2 * 16), np.float32)
    for ki in range(3):
        for j in range(ow2):
            for kj in range(3):
                c = 2 * j + kj
                t2[ki, c * 8:(c + 1) * 8, j * 16:(j + 1) * 16] = w2[:, :, ki, kj].T

    # global average pool + 1x1 conv3 fused: g[j*16+ic, k] = w3[k, ic]/(oh2*ow2)
    g = (np.tile(w3[:, :, 0, 0].T, (ow2, 1)) / float(oh2 * ow2)).astype(np.float32)

    packed = (t1, np.tile(b1, ow1)[None, :], t2, np.tile(b2, ow2)[None, :],
              g, b3[None, :])
    return tuple(jnp.asarray(a) for a in packed)


# ---------------------------------------------------------------------------
# Pure-JAX reference (mirrors the PyTorch forward) for validation
# ---------------------------------------------------------------------------
def reference_forward(x, torch_params, H, W):
    w1, b1, w2, b2, w3, b3 = torch_params
    x = x.reshape(-1, 1, H, W).astype(jnp.float32)

    def conv(x, w, stride):
        dn = jax.lax.conv_dimension_numbers(x.shape, w.shape,
                                            ('NCHW', 'OIHW', 'NCHW'))
        return jax.lax.conv_general_dilated(x, w, (stride, stride), 'VALID',
                                            dimension_numbers=dn)

    y = jax.nn.relu(conv(x, w1, 1) + b1[None, :, None, None])
    y = jax.nn.relu(conv(y, w2, 2) + b2[None, :, None, None])
    y = jnp.mean(y, axis=(2, 3), keepdims=True)      # global avg pool (square)
    y = conv(y, w3, 1) + b3[None, :, None, None]
    return y.reshape(y.shape[0], y.shape[1])


if __name__ == "__main__":
    key = jax.random.PRNGKey(0)
    pkey, xkey = jax.random.split(key)
    H = W = 16
    torch_params = init_params(pkey)
    packed_params = pack_params(torch_params, H, W)

    x = jax.random.normal(xkey, (2, 1, H, W), jnp.float32)

    fwd = jax.jit(functools.partial(too_simple_convnet_forward,
                                    input_height=H, input_width=W))
    out = jax.block_until_ready(fwd(x, packed_params))
    assert out.shape == (2, 6), out.shape

    ref = reference_forward(x, torch_params, H, W)
    if not jnp.allclose(out, ref, atol=1e-4, rtol=1e-4):
        raise AssertionError("Pallas output mismatch vs JAX reference")

    print("KERNEL_OK")
</pallas_src>

<mosaic_0001>
module attributes {stable_mosaic.version = 11 : i64} {
  func.func @_fused_convnet_kernel(%arg0: i32, %arg1: memref<2x2x8x16xf32, #tpu.memory_space<vmem>>, %arg2: memref<3x16x112xf32, #tpu.memory_space<vmem>>, %arg3: memref<1x112xf32, #tpu.memory_space<vmem>>, %arg4: memref<3x112x96xf32, #tpu.memory_space<vmem>>, %arg5: memref<1x96xf32, #tpu.memory_space<vmem>>, %arg6: memref<96x6xf32, #tpu.memory_space<vmem>>, %arg7: memref<1x6xf32, #tpu.memory_space<vmem>>, %arg8: memref<2x1x6xf32, #tpu.memory_space<vmem>>) attributes {dimension_semantics = [#tpu.dimension_semantics<parallel>], iteration_bounds = array<i64: 1>, scalar_prefetch = 0 : i64, scratch_operands = 0 : i64, tpu.core_type = #tpu.core_type<tc>, window_params = [{transform_indices = @transform_0, window_bounds = array<i64: 2, 2, 8, 16>}, {pipeline_mode = #tpu.pipeline_mode<synchronous>, transform_indices = @transform_1, window_bounds = array<i64: 3, 16, 112>}, {pipeline_mode = #tpu.pipeline_mode<synchronous>, transform_indices = @transform_2, window_bounds = array<i64: 1, 112>}, {pipeline_mode = #tpu.pipeline_mode<synchronous>, transform_indices = @transform_3, window_bounds = array<i64: 3, 112, 96>}, {pipeline_mode = #tpu.pipeline_mode<synchronous>, transform_indices = @transform_4, window_bounds = array<i64: 1, 96>}, {pipeline_mode = #tpu.pipeline_mode<synchronous>, transform_indices = @transform_5, window_bounds = array<i64: 96, 6>}, {pipeline_mode = #tpu.pipeline_mode<synchronous>, transform_indices = @transform_6, window_bounds = array<i64: 1, 6>}, {transform_indices = @transform_7, window_bounds = array<i64: 2, 1, 6>}]} {
    %c0 = arith.constant 0 : index
    %c0_0 = arith.constant 0 : index
    %c0_1 = arith.constant 0 : index
    %c0_2 = arith.constant 0 : index
    %0 = vector.load %arg1[%c0, %c0_0, %c0_1, %c0_2] : memref<2x2x8x16xf32, #tpu.memory_space<vmem>>, vector<2x1x7x16xf32>
    %1 = vector.shape_cast %0 : vector<2x1x7x16xf32> to vector<2x7x16xf32>
    %2 = vector.shape_cast %1 : vector<2x7x16xf32> to vector<14x16xf32>
    %c0_3 = arith.constant 0 : index
    %c0_4 = arith.constant 0 : index
    %c0_5 = arith.constant 0 : index
    %3 = vector.load %arg2[%c0_3, %c0_4, %c0_5] : memref<3x16x112xf32, #tpu.memory_space<vmem>>, vector<1x16x112xf32>
    %4 = vector.shape_cast %3 : vector<1x16x112xf32> to vector<16x112xf32>
    %cst = arith.constant dense<0.000000e+00> : vector<14x112xf32>
    %5 = tpu.matmul %2, %4, %cst {dimension_numbers = #tpu.dot_dimension_numbers<[1], [0], [0], [1], [0, 0, 1, 1], [], []>} : vector<14x16xf32>, vector<16x112xf32>, vector<14x112xf32> -> vector<14x112xf32>
    %c0_6 = arith.constant 0 : index
    %c1 = arith.constant 1 : index
    %c0_7 = arith.constant 0 : index
    %c0_8 = arith.constant 0 : index
    %6 = vector.load %arg1[%c0_6, %c1, %c0_7, %c0_8] : memref<2x2x8x16xf32, #tpu.memory_space<vmem>>, vector<2x1x7x16xf32>
    %7 = vector.shape_cast %6 : vector<2x1x7x16xf32> to vector<2x7x16xf32>
    %8 = vector.shape_cast %7 : vector<2x7x16xf32> to vector<14x16xf32>
    %c1_9 = arith.constant 1 : index
    %c0_10 = arith.constant 0 : index
    %c0_11 = arith.constant 0 : index
    %9 = vector.load %arg2[%c1_9, %c0_10, %c0_11] : memref<3x16x112xf32, #tpu.memory_space<vmem>>, vector<1x16x112xf32>
    %10 = vector.shape_cast %9 : vector<1x16x112xf32> to vector<16x112xf32>
    %cst_12 = arith.constant dense<0.000000e+00> : vector<14x112xf32>
    %11 = tpu.matmul %8, %10, %cst_12 {dimension_numbers = #tpu.dot_dimension_numbers<[1], [0], [0], [1], [0, 0, 1, 1], [], []>} : vector<14x16xf32>, vector<16x112xf32>, vector<14x112xf32> -> vector<14x112xf32>
    %12 = arith.addf %5, %11 : vector<14x112xf32>
    %c0_13 = arith.constant 0 : index
    %c0_14 = arith.constant 0 : index
    %c1_15 = arith.constant 1 : index
    %c0_16 = arith.constant 0 : index
    %13 = vector.load %arg1[%c0_13, %c0_14, %c1_15, %c0_16] : memref<2x2x8x16xf32, #tpu.memory_space<vmem>>, vector<2x1x7x16xf32>
    %14 = vector.shape_cast %13 : vector<2x1x7x16xf32> to vector<2x7x16xf32>
    %15 = vector.shape_cast %14 : vector<2x7x16xf32> to vector<14x16xf32>
    %c2 = arith.constant 2 : index
    %c0_17 = arith.constant 0 : index
    %c0_18 = arith.constant 0 : index
    %16 = vector.load %arg2[%c2, %c0_17, %c0_18] : memref<3x16x112xf32, #tpu.memory_space<vmem>>, vector<1x16x112xf32>
    %17 = vector.shape_cast %16 : vector<1x16x112xf32> to vector<16x112xf32>
    %cst_19 = arith.constant dense<0.000000e+00> : vector<14x112xf32>
    %18 = tpu.matmul %15, %17, %cst_19 {dimension_numbers = #tpu.dot_dimension_numbers<[1], [0], [0], [1], [0, 0, 1, 1], [], []>} : vector<14x16xf32>, vector<16x112xf32>, vector<14x112xf32> -> vector<14x112xf32>
    %19 = arith.addf %12, %18 : vector<14x112xf32>
    %c0_20 = arith.constant 0 : index
    %c0_21 = arith.constant 0 : index
    %20 = vector.load %arg3[%c0_20, %c0_21] : memref<1x112xf32, #tpu.memory_space<vmem>>, vector<1x112xf32>
    %21 = vector.broadcast %20 : vector<1x112xf32> to vector<14x112xf32>
    %22 = arith.addf %19, %21 : vector<14x112xf32>
    %cst_22 = arith.constant 0.000000e+00 : f32
    %23 = vector.broadcast %cst_22 : f32 to vector<14x112xf32>
    %24 = arith.maximumf %22, %23 : vector<14x112xf32>
    %25 = vector.shape_cast %24 : vector<14x112xf32> to vector<2x7x112xf32>
    %c0_23 = arith.constant 0 : index
    %c1_24 = arith.constant 1 : index
    %c0_25 = arith.constant 0 : index
    %c0_26 = arith.constant 0 : index
    %26 = vector.load %arg1[%c0_23, %c1_24, %c0_25, %c0_26] : memref<2x2x8x16xf32, #tpu.memory_space<vmem>>, vector<2x1x7x16xf32>
    %27 = vector.shape_cast %26 : vector<2x1x7x16xf32> to vector<2x7x16xf32>
    %28 = vector.shape_cast %27 : vector<2x7x16xf32> to vector<14x16xf32>
    %c0_27 = arith.constant 0 : index
    %c0_28 = arith.constant 0 : index
    %c0_29 = arith.constant 0 : index
    %29 = vector.load %arg2[%c0_27, %c0_28, %c0_29] : memref<3x16x112xf32, #tpu.memory_space<vmem>>, vector<1x16x112xf32>
    %30 = vector.shape_cast %29 : vector<1x16x112xf32> to vector<16x112xf32>
    %cst_30 = arith.constant dense<0.000000e+00> : vector<14x112xf32>
    %31 = tpu.matmul %28, %30, %cst_30 {dimension_numbers = #tpu.dot_dimension_numbers<[1], [0], [0], [1], [0, 0, 1, 1], [], []>} : vector<14x16xf32>, vector<16x112xf32>, vector<14x112xf32> -> vector<14x112xf32>
    %c0_31 = arith.constant 0 : index
    %c0_32 = arith.constant 0 : index
    %c1_33 = arith.constant 1 : index
    %c0_34 = arith.constant 0 : index
    %32 = vector.load %arg1[%c0_31, %c0_32, %c1_33, %c0_34] : memref<2x2x8x16xf32, #tpu.memory_space<vmem>>, vector<2x1x7x16xf32>
    %33 = vector.shape_cast %32 : vector<2x1x7x16xf32> to vector<2x7x16xf32>
    %34 = vector.shape_cast %33 : vector<2x7x16xf32> to vector<14x16xf32>
    %c1_35 = arith.constant 1 : index
    %c0_36 = arith.constant 0 : index
    %c0_37 = arith.constant 0 : index
    %35 = vector.load %arg2[%c1_35, %c0_36, %c0_37] : memref<3x16x112xf32, #tpu.memory_space<vmem>>, vector<1x16x112xf32>
    %36 = vector.shape_cast %35 : vector<1x16x112xf32> to vector<16x112xf32>
    %cst_38 = arith.constant dense<0.000000e+00> : vector<14x112xf32>
    %37 = tpu.matmul %34, %36, %cst_38 {dimension_numbers = #tpu.dot_dimension_numbers<[1], [0], [0], [1], [0, 0, 1, 1], [], []>} : vector<14x16xf32>, vector<16x112xf32>, vector<14x112xf32> -> vector<14x112xf32>
    %38 = arith.addf %31, %37 : vector<14x112xf32>
    %c0_39 = arith.constant 0 : index
    %c1_40 = arith.constant 1 : index
    %c1_41 = arith.constant 1 : index
    %c0_42 = arith.constant 0 : index
    %39 = vector.load %arg1[%c0_39, %c1_40, %c1_41, %c0_42] : memref<2x2x8x16xf32, #tpu.memory_space<vmem>>, vector<2x1x7x16xf32>
    %40 = vector.shape_cast %39 : vector<2x1x7x16xf32> to vector<2x7x16xf32>
    %41 = vector.shape_cast %40 : vector<2x7x16xf32> to vector<14x16xf32>
    %c2_43 = arith.constant 2 : index
    %c0_44 = arith.constant 0 : index
    %c0_45 = arith.constant 0 : index
    %42 = vector.load %arg2[%c2_43, %c0_44, %c0_45] : memref<3x16x112xf32, #tpu.memory_space<vmem>>, vector<1x16x112xf32>
    %43 = vector.shape_cast %42 : vector<1x16x112xf32> to vector<16x112xf32>
    %cst_46 = arith.constant dense<0.000000e+00> : vector<14x112xf32>
    %44 = tpu.matmul %41, %43, %cst_46 {dimension_numbers = #tpu.dot_dimension_numbers<[1], [0], [0], [1], [0, 0, 1, 1], [], []>} : vector<14x16xf32>, vector<16x112xf32>, vector<14x112xf32> -> vector<14x112xf32>
    %45 = arith.addf %38, %44 : vector<14x112xf32>
    %c0_47 = arith.constant 0 : index
    %c0_48 = arith.constant 0 : index
    %46 = vector.load %arg3[%c0_47, %c0_48] : memref<1x112xf32, #tpu.memory_space<vmem>>, vector<1x112xf32>
    %47 = vector.broadcast %46 : vector<1x112xf32> to vector<14x112xf32>
    %48 = arith.addf %45, %47 : vector<14x112xf32>
    %cst_49 = arith.constant 0.000000e+00 : f32
    %49 = vector.broadcast %cst_49 : f32 to vector<14x112xf32>
    %50 = arith.maximumf %48, %49 : vector<14x112xf32>
    %51 = vector.shape_cast %50 : vector<14x112xf32> to vector<2x7x112xf32>
    %52 = vector.extract_strided_slice %25 {offsets = [0, 0, 0], sizes = [2, 6, 112], strides = [1, 1, 1]} : vector<2x7x112xf32> to vector<2x6x112xf32>
    %53 = vector.shape_cast %52 : vector<2x6x112xf32> to vector<12x112xf32>
    %c0_50 = arith.constant 0 : index
    %c0_51 = arith.constant 0 : index
    %c0_52 = arith.constant 0 : index
    %54 = vector.load %arg4[%c0_50, %c0_51, %c0_52] : memref<3x112x96xf32, #tpu.memory_space<vmem>>, vector<1x112x96xf32>
    %55 = vector.shape_cast %54 : vector<1x112x96xf32> to vector<112x96xf32>
    %cst_53 = arith.constant dense<0.000000e+00> : vector<12x96xf32>
    %56 = tpu.matmul %53, %55, %cst_53 {dimension_numbers = #tpu.dot_dimension_numbers<[1], [0], [0], [1], [0, 0, 1, 1], [], []>} : vector<12x112xf32>, vector<112x96xf32>, vector<12x96xf32> -> vector<12x96xf32>
    %57 = vector.extract_strided_slice %51 {offsets = [0, 0, 0], sizes = [2, 6, 112], strides = [1, 1, 1]} : vector<2x7x112xf32> to vector<2x6x112xf32>
    %58 = vector.shape_cast %57 : vector<2x6x112xf32> to vector<12x112xf32>
    %c1_54 = arith.constant 1 : index
    %c0_55 = arith.constant 0 : index
    %c0_56 = arith.constant 0 : index
    %59 = vector.load %arg4[%c1_54, %c0_55, %c0_56] : memref<3x112x96xf32, #tpu.memory_space<vmem>>, vector<1x112x96xf32>
    %60 = vector.shape_cast %59 : vector<1x112x96xf32> to vector<112x96xf32>
    %cst_57 = arith.constant dense<0.000000e+00> : vector<12x96xf32>
    %61 = tpu.matmul %58, %60, %cst_57 {dimension_numbers = #tpu.dot_dimension_numbers<[1], [0], [0], [1], [0, 0, 1, 1], [], []>} : vector<12x112xf32>, vector<112x96xf32>, vector<12x96xf32> -> vector<12x96xf32>
    %62 = arith.addf %56, %61 : vector<12x96xf32>
    %63 = vector.extract_strided_slice %25 {offsets = [0, 1, 0], sizes = [2, 6, 112], strides = [1, 1, 1]} : vector<2x7x112xf32> to vector<2x6x112xf32>
    %64 = vector.shape_cast %63 : vector<2x6x112xf32> to vector<12x112xf32>
    %c2_58 = arith.constant 2 : index
    %c0_59 = arith.constant 0 : index
    %c0_60 = arith.constant 0 : index
    %65 = vector.load %arg4[%c2_58, %c0_59, %c0_60] : memref<3x112x96xf32, #tpu.memory_space<vmem>>, vector<1x112x96xf32>
    %66 = vector.shape_cast %65 : vector<1x112x96xf32> to vector<112x96xf32>
    %cst_61 = arith.constant dense<0.000000e+00> : vector<12x96xf32>
    %67 = tpu.matmul %64, %66, %cst_61 {dimension_numbers = #tpu.dot_dimension_numbers<[1], [0], [0], [1], [0, 0, 1, 1], [], []>} : vector<12x112xf32>, vector<112x96xf32>, vector<12x96xf32> -> vector<12x96xf32>
    %68 = arith.addf %62, %67 : vector<12x96xf32>
    %c0_62 = arith.constant 0 : index
    %c0_63 = arith.constant 0 : index
    %69 = vector.load %arg5[%c0_62, %c0_63] : memref<1x96xf32, #tpu.memory_space<vmem>>, vector<1x96xf32>
    %70 = vector.broadcast %69 : vector<1x96xf32> to vector<12x96xf32>
    %71 = arith.addf %68, %70 : vector<12x96xf32>
    %cst_64 = arith.constant 0.000000e+00 : f32
    %72 = vector.broadcast %cst_64 : f32 to vector<12x96xf32>
    %73 = arith.maximumf %71, %72 : vector<12x96xf32>
    %74 = vector.shape_cast %73 : vector<12x96xf32> to vector<2x6x96xf32>
    %cst_65 = arith.constant dense<0.000000e+00> : vector<2x96xf32>
    %75 = vector.multi_reduction <add>, %74, %cst_65 [1] : vector<2x6x96xf32> to vector<2x96xf32>
    %c0_66 = arith.constant 0 : index
    %c0_67 = arith.constant 0 : index
    %76 = vector.load %arg6[%c0_66, %c0_67] : memref<96x6xf32, #tpu.memory_space<vmem>>, vector<96x6xf32>
    %cst_68 = arith.constant dense<0.000000e+00> : vector<2x6xf32>
    %77 = tpu.matmul %75, %76, %cst_68 {dimension_numbers = #tpu.dot_dimension_numbers<[1], [0], [0], [1], [0, 0, 1, 1], [], []>} : vector<2x96xf32>, vector<96x6xf32>, vector<2x6xf32> -> vector<2x6xf32>
    %c0_69 = arith.constant 0 : index
    %c0_70 = arith.constant 0 : index
    %78 = vector.load %arg7[%c0_69, %c0_70] : memref<1x6xf32, #tpu.memory_space<vmem>>, vector<1x6xf32>
    %79 = vector.broadcast %78 : vector<1x6xf32> to vector<2x6xf32>
    %80 = arith.addf %77, %79 : vector<2x6xf32>
    %81 = vector.shape_cast %80 : vector<2x6xf32> to vector<2x1x6xf32>
    %c0_71 = arith.constant 0 : index
    %c0_72 = arith.constant 0 : index
    %c0_73 = arith.constant 0 : index
    %82 = vector.load %arg8[%c0_71, %c0_72, %c0_73] : memref<2x1x6xf32, #tpu.memory_space<vmem>>, vector<2x1x6xf32>
    tpu.vector_store %arg8[%c0_71, %c0_72, %c0_73], %81 {strides = array<i32>} : memref<2x1x6xf32, #tpu.memory_space<vmem>>, vector<2x1x6xf32>,
    return
  }
  func.func @transform_0(%arg0: i32) -> (i32, i32, i32, i32) {
    %c0_i32 = arith.constant 0 : i32
    %c0_i32_0 = arith.constant 0 : i32
    %c0_i32_1 = arith.constant 0 : i32
    %c0_i32_2 = arith.constant 0 : i32
    return %arg0, %c0_i32, %c0_i32_0, %c0_i32_1 : i32, i32, i32, i32
  }
  func.func @transform_1(%arg0: i32) -> (i32, i32, i32) {
    %c0_i32 = arith.constant 0 : i32
    %c0_i32_0 = arith.constant 0 : i32
    %c0_i32_1 = arith.constant 0 : i32
    %c0_i32_2 = arith.constant 0 : i32
    return %c0_i32, %c0_i32_0, %c0_i32_1 : i32, i32, i32
  }
  func.func @transform_2(%arg0: i32) -> (i32, i32) {
    %c0_i32 = arith.constant 0 : i32
    %c0_i32_0 = arith.constant 0 : i32
    %c0_i32_1 = arith.constant 0 : i32
    return %c0_i32, %c0_i32_0 : i32, i32
  }
  func.func @transform_3(%arg0: i32) -> (i32, i32, i32) {
    %c0_i32 = arith.constant 0 : i32
    %c0_i32_0 = arith.constant 0 : i32
    %c0_i32_1 = arith.constant 0 : i32
    %c0_i32_2 = arith.constant 0 : i32
    return %c0_i32, %c0_i32_0, %c0_i32_1 : i32, i32, i32
  }
  func.func @transform_4(%arg0: i32) -> (i32, i32) {
    %c0_i32 = arith.constant 0 : i32
    %c0_i32_0 = arith.constant 0 : i32
    %c0_i32_1 = arith.constant 0 : i32
    return %c0_i32, %c0_i32_0 : i32, i32
  }
  func.func @transform_5(%arg0: i32) -> (i32, i32) {
    %c0_i32 = arith.constant 0 : i32
    %c0_i32_0 = arith.constant 0 : i32
    %c0_i32_1 = arith.constant 0 : i32
    return %c0_i32, %c0_i32_0 : i32, i32
  }
  func.func @transform_6(%arg0: i32) -> (i32, i32) {
    %c0_i32 = arith.constant 0 : i32
    %c0_i32_0 = arith.constant 0 : i32
    %c0_i32_1 = arith.constant 0 : i32
    return %c0_i32, %c0_i32_0 : i32, i32
  }
  func.func @transform_7(%arg0: i32) -> (i32, i32, i32) {
    %c0_i32 = arith.constant 0 : i32
    %c0_i32_0 = arith.constant 0 : i32
    %c0_i32_1 = arith.constant 0 : i32
    return %arg0, %c0_i32, %c0_i32_0 : i32, i32, i32
  }
}

</mosaic_0001>

<bundles_post_ra>
// kernel: too_simple_convnet_forward.1
= control target key start
LH: loop header
LB: loop body
LE: loop exit
PB: predicated region body
PF: predicated region fallthrough
CT: control target
= control target key end

     0   :  { %v35_v3 = vlaneseq  ;;  %v2544_v5 = vmov 1966171168   ;;  %s3079_s0 = inlined_call_operand.vmem [shape: f32[2,2,8,16], index: 0, kind: input, shape index: {}]   ;;  %s3080_s1 = inlined_call_operand.vmem [shape: f32[3,16,112], index: 1, kind: input, shape index: {}]   ;;  %s3081_s2 = inlined_call_operand.vmem [shape: f32[1,112], index: 2, kind: input, shape index: {}]   ;;  %s3082_s3 = inlined_call_operand.vmem [shape: f32[3,112,96], index: 3, kind: input, shape index: {}]   ;;  %s3083_s4 = inlined_call_operand.vmem [shape: f32[1,96], index: 4, kind: input, shape index: {}]   ;;  %s3084_s5 = inlined_call_operand.vmem [shape: f32[96,6], index: 5, kind: input, shape index: {}]   ;;  %s3085_s6 = inlined_call_operand.vmem [shape: f32[1,6], index: 6, kind: input, shape index: {}]   ;;  %s3086_s7 = inlined_call_operand.hbm [shape: f32[2,1,6], index: 7, kind: output, shape index: {}]  }
   0x1   :  { %v2594_v0 = vld [vmem:[%s3080_s1 + $0x18] sm:$0xff]  ;;  %v2599_v1 = vld [vmem:[%s3080_s1 + $0x8] sm:$0xff]  ;;  %v2604_v2 = vld [vmem:[%s3080_s1 + $0x10] sm:$0xff]  ;;  %v33_v6 = vunpack.c.l.s4 %v2544_v5 }
   0x2   :  { %2345 = vmatprep.subr.mxu0 %v2594_v0  ;;  %2352 = vmatprep.subr.mxu1 %v2599_v1  ;;  %v2611_v4 = vld [vmem:[%s3080_s1] sm:$0xff]  ;;  %v2195_v7 = vld [vmem:[%s3079_s0 + $0x8] sm:$0x7f]  ;;  %v2618_v8 = vshrl.u32 %v35_v3, 7  ;;  %v2196_v9 = vld [vmem:[%s3079_s0 + $0x18] sm:$0x7f] }
   0x3   :  { %2346 = vmatpush3.msra.mxu0 %v2594_v0  ;;  %2353 = vmatpush3.msra.mxu1 %v2599_v1  ;;  %v27_v10 = vld [vmem:[%s3079_s0] sm:$0x7f]  ;;  %v2629_v11 = vld [vmem:[%s3080_s1 + $0x28] sm:$0xff]  ;;  %v34_v12 = vunpack.c.0.s8 %v33_v6  ;;  %v134_v13 = vcombine.high %v2195_v7, %v2195_v7  ;;  %v182_v14 = vcombine.high %v2196_v9, %v2196_v9  ;;  %v28_v15 = vld [vmem:[%s3079_s0 + $0x10] sm:$0x7f] }
   0x4   :  { %2347 = vmatprep.subr.mxu0 %v2604_v2  ;;  %2354 = vmatprep.subr.mxu1 %v2611_v4  ;;  %v2639_v16 = vld [vmem:[%s3079_s0 + $0x1] sm:$0x7f]  ;;  %v31_v17 = vcombine.high %v27_v10, %v27_v10  ;;  %v79_v18 = vcombine.high %v28_v15, %v28_v15  ;;  %v2646_v19 = vld [vmem:[%s3079_s0 + $0x9] sm:$0x7f] }
   0x5   :  { %2348 = vmatpush3.msra.mxu0 %v2604_v2  ;;  %2355 = vmatpush3.msra.mxu1 %v2611_v4 }
   0x6   :  { %12 = vsyncpa [#allocation3], 0  ;;  %v2649_v20 = vsub.s32 %v34_v12, %v2618_v8  ;;  %2359 = vmatprep.subr.mxu0 %v2629_v11  ;;  %2366 = vmatprep.subr.mxu1 %v2594_v0  ;;  %v2656_v21 = vld [vmem:[%s3079_s0 + $0x11] sm:$0x7f]  ;;  %v2661_v22 = vld [vmem:[%s3079_s0 + $0x19] sm:$0x7f]  ;;  %v574_v23 = vcombine.high %v2639_v16, %v2639_v16  ;;  %v1106_v25 = vcombine.high %v2646_v19, %v2646_v19 }
   0x7   :  { %v622_v24 = vcombine.high %v2656_v21, %v2656_v21  ;;  %v1154_v26 = vcombine.high %v2661_v22, %v2661_v22  ;;  %vm322_vm0 = vcmask 130048   ;;  %vm1567_vm1 = vcmask 916480   ;;  %s2548_s13 = smov [#allocation2]  }
   0x8   :  { %v141_v27 = vrot.slane %v2195_v7, %v2649_v20  ;;  %v148_v28 = vrot.slane %v134_v13, %v2649_v20  ;;  %v189_v29 = vrot.slane %v2196_v9, %v2649_v20  ;;  %v196_v30 = vrot.slane %v182_v14, %v2649_v20 }
   0x9   :  { %v38_v31 = vrot.slane %v27_v10, %v2649_v20  ;;  %v45_v32 = vrot.slane %v31_v17, %v2649_v20  ;;  %v86_v33 = vrot.slane %v28_v15, %v2649_v20  ;;  %v93_v34 = vrot.slane %v79_v18, %v2649_v20 }
   0xa   :  { %v149_v35 = vcombine.high %v141_v27, %v141_v27  ;;  %v150_v36 = vcombine.high %v148_v28, %v148_v28  ;;  %v157_v37 = vrot.slane %v141_v27, %v2649_v20  ;;  %v164_v38 = vrot.slane %v148_v28, %v2649_v20 }
   0xb   :  { %v197_v39 = vcombine.high %v189_v29, %v189_v29  ;;  %v205_v40 = vrot.slane %v189_v29, %v2649_v20  ;;  %v46_v41 = vcombine.high %v38_v31, %v38_v31  ;;  %v47_v42 = vcombine.high %v45_v32, %v45_v32 }
   0xc   :  { %v171_v43 = vrot.slane %v149_v35, %v2649_v20  ;;  %v178_v44 = vrot.slane %v150_v36, %v2649_v20  ;;  %v180_v45 = vcombine.high %v164_v38, %v164_v38  ;;  %v54_v46 = vrot.slane %v38_v31, %v2649_v20 }
   0xd   :  { %v227_v47 = vcombine.high %v205_v40, %v205_v40  ;;  %v61_v48 = vrot.slane %v45_v32, %v2649_v20  ;;  %v68_v49 = vrot.slane %v46_v41, %v2649_v20  ;;  %v75_v50 = vrot.slane %v47_v42, %v2649_v20 }
   0xe   :  { %v233_v51 = vcombine.low %v157_v37, %v171_v43  ;;  %v2199_v52 = vcombine.high %v157_v37, %v171_v43  ;;  %v235_v53 = vcombine.low %v164_v38, %v178_v44  ;;  %v236_v54 = vcombine.low %v180_v45, %v205_v40 }
   0xf   :  { %v77_v55 = vcombine.high %v61_v48, %v61_v48  ;;  %v94_v56 = vcombine.high %v86_v33, %v86_v33  ;;  %v102_v57 = vrot.slane %v86_v33, %v2649_v20  ;;  %v402_v58 = vcombine.low %v54_v46, %v68_v49 }
  0x10   :  { %v243_v59 = vrot.slane %v233_v51, %v2649_v20  ;;  %v250_v60 = vrot.slane %v2199_v52, %v2649_v20  ;;  %v257_v61 = vrot.slane %v235_v53, %v2649_v20  ;;  %v264_v62 = vrot.slane %v236_v54, %v2649_v20 }
  0x11   :  { %v124_v63 = vcombine.high %v102_v57, %v102_v57  ;;  %v2202_v3 = vcombine.high %v54_v46, %v68_v49  ;;  %v404_v5 = vcombine.low %v61_v48, %v75_v50  ;;  %v405_v6 = vcombine.low %v77_v55, %v102_v57 }
  0x12   :  { %v265_v7 = vcombine.low %v243_v59, %v250_v60  ;;  %v266_v9 = vcombine.low %v257_v61, %v264_v62  ;;  %v412_v10 = vrot.slane %v402_v58, %v2649_v20  ;;  %v198_v12 = vcombine.high %v196_v30, %v196_v30 }
  0x13   :  { %v419_v13 = vrot.slane %v2202_v3, %v2649_v20  ;;  %v426_v14 = vrot.slane %v404_v5, %v2649_v20  ;;  %v433_v15 = vrot.slane %v405_v6, %v2649_v20  ;;  %v212_v17 = vrot.slane %v196_v30, %v2649_v20 }
  0x14   :  { %v273_v18 = vrot.slane %v265_v7, %v2649_v20  ;;  %v280_v27 = vrot.slane %v266_v9, %v2649_v20  ;;  %v219_v28 = vrot.slane %v197_v39, %v2649_v20  ;;  %v226_v29 = vrot.slane %v198_v12, %v2649_v20 }
  0x15   :  { %v434_v31 = vcombine.low %v412_v10, %v419_v13  ;;  %v435_v32 = vcombine.low %v426_v14, %v433_v15  ;;  %v228_v33 = vcombine.high %v212_v17, %v212_v17  ;;  %v95_v35 = vcombine.high %v93_v34, %v93_v34 }
  0x16   :  { %v2702_v36 = vcombine.low %v273_v18, %v280_v27  ;;  %v229_v37 = vcombine.high %v219_v28, %v219_v28  ;;  %v282_v38 = vcombine.low %v219_v28, %v227_v47  ;;  %v109_v40 = vrot.slane %v93_v34, %v2649_v20 }
  0x17   :  { %v442_v30 = vrot.slane %v434_v31, %v2649_v20  ;;  %v449_v41 = vrot.slane %v435_v32, %v2649_v20  ;;  %v284_v42 = vcombine.low %v226_v29, %v228_v33  ;;  %v116_v43 = vrot.slane %v94_v56, %v2649_v20 }
  0x18   :  { %2349 = vmatprep.mubr.msk.f32.mxu0 %vm322_vm0, %v2702_v36  ;;  %v283_v39 = vcombine.low %v229_v37, %v212_v17  ;;  %v291_v44 = vrot.slane %v282_v38, %v2649_v20  ;;  %v123_v45 = vrot.slane %v95_v35, %v2649_v20  ;;  %v125_v46 = vcombine.high %v109_v40, %v109_v40 }
  0x19   :  { %v450_v48 = vcombine.low %v442_v30, %v449_v41  ;;  %v305_v47 = vrot.slane %v284_v42, %v2649_v20  ;;  %v126_v34 = vcombine.high %v116_v43, %v116_v43  ;;  %v451_v49 = vcombine.low %v116_v43, %v124_v63 }
  0x1a   :  { %v298_v50 = vrot.slane %v283_v39, %v2649_v20  ;;  %v453_v51 = vcombine.low %v123_v45, %v125_v46  ;;  %v581_v52 = vrot.slane %v2639_v16, %v2649_v20  ;;  %v588_v53 = vrot.slane %v574_v23, %v2649_v20 }
  0x1b   :  { %2356 = vmatprep.mubr.msk.f32.mxu1 %vm322_vm0, %v450_v48  ;;  %v320_v54 = vrot.slane %v305_v47, %v2649_v20  ;;  %v452_v55 = vcombine.low %v126_v34, %v109_v40  ;;  %v460_v56 = vrot.slane %v451_v49, %v2649_v20  ;;  %v629_v57 = vrot.slane %v2656_v21, %v2649_v20 }
  0x1c   :  { %v306_v58 = vcombine.low %v291_v44, %v298_v50  ;;  %v474_v59 = vrot.slane %v453_v51, %v2649_v20  ;;  %v589_v60 = vcombine.high %v581_v52, %v581_v52  ;;  %v590_v61 = vcombine.high %v588_v53, %v588_v53 }
  0x1d   :  { %v467_v62 = vrot.slane %v452_v55, %v2649_v20  ;;  %v597_v16 = vrot.slane %v581_v52, %v2649_v20  ;;  %v604_v23 = vrot.slane %v588_v53, %v2649_v20  ;;  %v636_v63 = vrot.slane %v622_v24, %v2649_v20  ;;  %v2744_v24 = vld [vmem:[%s3080_s1 + $0x20] sm:$0xff] }
  0x1e   :  { %v313_v3 = vrot.slane %v306_v58, %v2649_v20  ;;  %v489_v5 = vrot.slane %v474_v59, %v2649_v20  ;;  %v611_v6 = vrot.slane %v589_v60, %v2649_v20  ;;  %v618_v7 = vrot.slane %v590_v61, %v2649_v20 }
  0x1f   :  { %v475_v9 = vcombine.low %v460_v56, %v467_v62  ;;  %v620_v10 = vcombine.high %v604_v23, %v604_v23  ;;  %v637_v12 = vcombine.high %v629_v57, %v629_v57  ;;  %v645_v13 = vrot.slane %v629_v57, %v2649_v20 }
  0x20   :  { %v2738_v14 = vcombine.low %v313_v3, %v320_v54  ;;  %v673_v15 = vcombine.low %v597_v16, %v611_v6  ;;  %v2207_v17 = vcombine.high %v597_v16, %v611_v6  ;;  %v675_v18 = vcombine.low %v604_v23, %v618_v7 }
  0x21   :  { %v482_v21 = vrot.slane %v475_v9, %v2649_v20  ;;  %v667_v27 = vcombine.high %v645_v13, %v645_v13  ;;  %v676_v28 = vcombine.low %v620_v10, %v645_v13  ;;  %v638_v29 = vcombine.high %v636_v63, %v636_v63 }
  0x22   :  { %2350 = vmatmul.mubr.msk.f32.vlgmr.msra.gmra.mxu0 %vm322_vm0, %v2738_v14  ;;  %v683_v31 = vrot.slane %v673_v15, %v2649_v20  ;;  %v690_v32 = vrot.slane %v2207_v17, %v2649_v20  ;;  %v697_v33 = vrot.slane %v675_v18, %v2649_v20  ;;  %v652_v35 = vrot.slane %v636_v63, %v2649_v20 }
  0x23   :  { %v490_v37 = vcombine.low %v482_v21, %v489_v5  ;;  %2360 = vmatpush3.msra.mxu0 %v2629_v11  ;;  %v704_v38 = vrot.slane %v676_v28, %v2649_v20  ;;  %v659_v40 = vrot.slane %v637_v12, %v2649_v20  ;;  %v666_v30 = vrot.slane %v638_v29, %v2649_v20 }
  0x24   :  { %2361 = vmatprep.subr.mxu0 %v2744_v24  ;;  %v705_v41 = vcombine.low %v683_v31, %v690_v32  ;;  %v668_v42 = vcombine.high %v652_v35, %v652_v35  ;;  %v1113_v43 = vrot.slane %v2646_v19, %v2649_v20  ;;  %v1120_v39 = vrot.slane %v1106_v25, %v2649_v20 }
  0x25   :  { %2357 = vmatmul.mubr.msk.f32.vlgmr.msra.gmra.mxu1 %vm322_vm0, %v490_v37  ;;  %2362 = vmatpush3.msra.mxu0 %v2744_v24  ;;  %v706_v44 = vcombine.low %v697_v33, %v704_v38  ;;  %v669_v45 = vcombine.high %v659_v40, %v659_v40  ;;  %v722_v46 = vcombine.low %v659_v40, %v667_v27  ;;  %vm2546_vm2 = vmmov 0  }
  0x26   :  { %2367 = vmatpush3.msra.mxu1 %v2594_v0  ;;  %v713_v48 = vrot.slane %v705_v41, %v2649_v20  ;;  %2373 = vmatprep.subr.mxu0 %v2599_v1  ;;  %v724_v47 = vcombine.low %v666_v30, %v668_v42  ;;  %v1121_v34 = vcombine.high %v1113_v43, %v1113_v43  ;;  %vm2040_vm3 = vcmask 783360  }
  0x27   :  { %2368 = vmatprep.subr.mxu1 %v2604_v2  ;;  %v720_v19 = vrot.slane %v706_v44, %v2649_v20  ;;  %v723_v25 = vcombine.low %v669_v45, %v652_v35  ;;  %v731_v49 = vrot.slane %v722_v46, %v2649_v20  ;;  %v1122_v50 = vcombine.high %v1120_v39, %v1120_v39  ;;  %v1474_v44 = vld [vmem:[%s3082_s3 + $0x48] sm:$0xff]  ;;  %v1473_v46 = vld [vmem:[%s3082_s3 + $0x40] sm:$0xff] }
  0x28   :  { %2369 = vmatpush3.msra.mxu1 %v2604_v2  ;;  %v745_v51 = vrot.slane %v724_v47, %v2649_v20  ;;  %v1129_v0 = vrot.slane %v1113_v43, %v2649_v20  ;;  %v1136_v52 = vrot.slane %v1120_v39, %v2649_v20  ;;  %v1143_v53 = vrot.slane %v1121_v34, %v2649_v20  ;;  %v1475_v43 = vld [vmem:[%s3082_s3 + $0x50] sm:$0xff]  ;;  %v2231_v45 = vld [vmem:[%s3082_s3 + $0xc8] sm:$0xff]  ;;  %v1472_v47 = vld [vmem:[%s3082_s3 + $0x38] sm:$0xff] }
  0x29   :  { %v721_v54 = vcombine.low %v713_v48, %v720_v19  ;;  %v738_v55 = vrot.slane %v723_v25, %v2649_v20  ;;  %2380 = vmatprep.subr.mxu1 %v2629_v11  ;;  %v1150_v56 = vrot.slane %v1122_v50, %v2649_v20  ;;  %v1161_v57 = vrot.slane %v2661_v22, %v2649_v20  ;;  %v2232_v39 = vld [vmem:[%s3082_s3 + $0xd0] sm:$0xff]  ;;  %v2230_v48 = vld [vmem:[%s3082_s3 + $0xc0] sm:$0xff]  ;;  %v2229_v34 = vld [vmem:[%s3082_s3 + $0xb8] sm:$0xff] }
  0x2a   :  { %v760_v2 = vrot.slane %v745_v51, %v2649_v20  ;;  %v1152_v58 = vcombine.high %v1136_v52, %v1136_v52  ;;  %v1168_v59 = vrot.slane %v1154_v26, %v2649_v20  ;;  %v1202_v60 = vcombine.low %v1129_v0, %v1143_v53  ;;  %v1471_v19 = vld [vmem:[%s3082_s3 + $0x30] sm:$0xff]  ;;  %v2227_v50 = vld [vmem:[%s3082_s3 + $0xa8] sm:$0xff]  ;;  %v1469_v51 = vld [vmem:[%s3082_s3 + $0x20] sm:$0xff] }
  0x2b   :  { %2363 = vmatprep.mubr.msk.f32.mxu0 %vm322_vm0, %v721_v54  ;;  %2370 = vmatprep.mubr.msk.f32.mxu1 %vm322_vm0, %v721_v54  ;;  %v746_v61 = vcombine.low %v731_v49, %v738_v55  ;;  %v1169_v62 = vcombine.high %v1161_v57, %v1161_v57  ;;  %v1177_v16 = vrot.slane %v1161_v57, %v2649_v20  ;;  %v2228_v25 = vld [vmem:[%s3082_s3 + $0xb0] sm:$0xff]  ;;  %v1470_v49 = vld [vmem:[%s3082_s3 + $0x28] sm:$0xff]  ;;  %vm2076_vm4 = vcmask 1041409  }
  0x2c   :  { %v2217_v23 = vcombine.high %v1129_v0, %v1143_v53  ;;  %v1204_v63 = vcombine.low %v1136_v52, %v1150_v56  ;;  %v1212_v3 = vrot.slane %v1202_v60, %v2649_v20  ;;  %v1170_v5 = vcombine.high %v1168_v59, %v1168_v59  ;;  %v2226_v0 = vld [vmem:[%s3082_s3 + $0xa0] sm:$0xff]  ;;  %v1468_v52 = vld [vmem:[%s3082_s3 + $0x18] sm:$0xff]  ;;  %v1467_v54 = vld [vmem:[%s3082_s3 + $0x10] sm:$0xff] }
  0x2d   :  { %v753_v6 = vrot.slane %v746_v61, %v2649_v20  ;;  %v1199_v7 = vcombine.high %v1177_v16, %v1177_v16  ;;  %v1205_v9 = vcombine.low %v1152_v58, %v1177_v16  ;;  %v1184_v22 = vrot.slane %v1168_v59, %v2649_v20  ;;  %v2225_v53 = vld [vmem:[%s3082_s3 + $0x98] sm:$0xff]  ;;  %v2224_v55 = vld [vmem:[%s3082_s3 + $0x90] sm:$0xff]  ;;  %v1466_v56 = vld [vmem:[%s3082_s3 + $0x8] sm:$0xff] }
  0x2e   :  { %v1219_v26 = vrot.slane %v2217_v23, %v2649_v20  ;;  %v1226_v10 = vrot.slane %v1204_v63, %v2649_v20  ;;  %v1191_v12 = vrot.slane %v1169_v62, %v2649_v20  ;;  %v1198_v13 = vrot.slane %v1170_v5, %v2649_v20  ;;  %v2223_v57 = vld [vmem:[%s3082_s3 + $0x88] sm:$0xff]  ;;  %v2222_v58 = vld [vmem:[%s3082_s3 + $0x80] sm:$0xff]  ;;  %v2221_v59 = vld [vmem:[%s3082_s3 + $0x78] sm:$0xff] }
  0x2f   :  { %v761_v15 = vcombine.low %v753_v6, %v760_v2  ;;  %v1233_v17 = vrot.slane %v1205_v9, %v2649_v20  ;;  %v1200_v18 = vcombine.high %v1184_v22, %v1184_v22  ;;  %v1465_v2 = vld [vmem:[%s3082_s3] sm:$0xff]  ;;  %v2220_v60 = vld [vmem:[%s3082_s3 + $0x70] sm:$0xff]  ;;  %v2905_v61 = vld [vmem:[%s3082_s3 + $0x148] sm:$0xff]  ;;  %vm2078_vm5 = vcmask 785408  }
  0x30   :  { %v1234_v21 = vcombine.low %v1212_v3, %v1219_v26  ;;  %v1201_v27 = vcombine.high %v1191_v12, %v1191_v12  ;;  %v1251_v28 = vcombine.low %v1191_v12, %v1199_v7  ;;  %v2210_v6 = vld [vmem:[%s3081_s2] ss:$0 sm:$0xff]  ;;  %vm2176_vm6 = vcmask 40960   ;;  %s2184_s2 = sshll.u32 %s2548_s13, 4  ;;  %s2185_s2 = int_to_ptr.vmem [resolvable:$true] %s2184_s2 }
  0x31   :  { %2364 = vmatmul.mubr.msk.f32.vlgmr.msra.gmra.mxu0 %vm322_vm0, %v761_v15  ;;  %2371 = vmatmul.mubr.msk.f32.vlgmr.msra.gmra.mxu1 %vm322_vm0, %v761_v15  ;;  %v1235_v29 = vcombine.low %v1226_v10, %v1233_v17  ;;  %v1253_v31 = vcombine.low %v1198_v13, %v1200_v18  ;;  %s2522_s14 = scalar_lea.vmem %s2185_s2, 32  ;;  %p2527_p1 = scmp.lt.s32.totalorder %s2185_s2, %s2185_s2 }
  0x32   :  { %2374 = vmatpush3.msra.mxu0 %v2599_v1  ;;  %2381 = vmatpush3.msra.mxu1 %v2629_v11  ;;  %v1242_v32 = vrot.slane %v1234_v21, %v2649_v20  ;;  %v1252_v33 = vcombine.low %v1201_v27, %v1184_v22  ;;  %v1260_v35 = vrot.slane %v1251_v28, %v2649_v20  ;;  %p2523_p0 = scmp.ne.s32.totalorder %s2185_s2, %s2522_s14  ;;  %p2528_p2 = scmp.lt.s32.totalorder %s2522_s14, %s2522_s14 }
  0x33   :  { %2375 = vmatprep.subr.mxu0 %v2611_v4  ;;  %2382 = vmatprep.subr.mxu1 %v2744_v24  ;;  %v1249_v37 = vrot.slane %v1235_v29, %v2649_v20  ;;  %v1274_v38 = vrot.slane %v1253_v31, %v2649_v20 }
  0x34   :  { %2376 = vmatpush3.msra.mxu0 %v2611_v4  ;;  %2377 = vmatprep.mubr.msk.f32.mxu0 %vm322_vm0, %v2702_v36  ;;  %v1267_v1 = vrot.slane %v1252_v33, %v2649_v20  ;;  %v1478_v4 = vld [vmem:[%s3082_s3 + $0x68] sm:$0xff]  ;;  %v1477_v36 = vld [vmem:[%s3082_s3 + $0x60] sm:$0xff]  ;;  %p2529_p3 = por %p2528_p2, %p2527_p1 }
  0x35   :  { %2383 = vmatpush3.msra.mxu1 %v2744_v24  ;;  %v1250_v11 = vcombine.low %v1242_v32, %v1249_v37  ;;  %2378 = vmatmul.mubr.msk.f32.vlgmr.msra.gmra.mxu0 %vm322_vm0, %v2738_v14  ;;  %v1289_v30 = vrot.slane %v1274_v38, %v2649_v20  ;;  %v1476_v14 = vld [vmem:[%s3082_s3 + $0x58] sm:$0xff] }
  0x36   :  { %v1275_v40 = vcombine.low %v1260_v35, %v1267_v1  ;;  %2418 = vmatprep.subr.mxu1 %v1478_v4  ;;  %v2233_v24 = vld [vmem:[%s3082_s3 + $0xd8] sm:$0xff]  ;;  %p2530_p4 = pnand %p2529_p3, %p2523_p0 }
  0x37   :  { %2384 = vmatprep.mubr.msk.f32.mxu1 %vm322_vm0, %v1250_v11  ;;  %2387 = vmatprep.subr.mxu0 %v2233_v24 }
  0x38   :  { %v1282_v41 = vrot.slane %v1275_v40, %v2649_v20  ;;  %2388 = vmatpush3.msra.mxu0 %v2233_v24 }
  0x39   :  { %2389 = vmatprep.subr.mxu0 %v2232_v39 }
  0x3a   :  { %v1290_v42 = vcombine.low %v1282_v41, %v1289_v30  ;;  %2390 = vmatpush3.msra.mxu0 %v2232_v39 }
  0x3b   :  { %2391 = vmatprep.subr.mxu0 %v2231_v45 }
  0x3c   :  { %2385 = vmatmul.mubr.msk.f32.vlgmr.msra.gmra.mxu1 %vm322_vm0, %v1290_v42  ;;  %2392 = vmatpush3.msra.mxu0 %v2231_v45 }
  0x3d   :  { %2419 = vmatpush3.msra.mxu1 %v1478_v4  ;;  %2393 = vmatprep.subr.mxu0 %v2230_v48 }
  0x3e   :  { %2420 = vmatprep.subr.mxu1 %v1477_v36  ;;  %2394 = vmatpush3.msra.mxu0 %v2230_v48 }
  0x3f   :  { %2421 = vmatpush3.msra.mxu1 %v1477_v36  ;;  %2395 = vmatprep.subr.mxu0 %v2229_v34 }
  0x40   :  { %2422 = vmatprep.subr.mxu1 %v1476_v14  ;;  %2396 = vmatpush3.msra.mxu0 %v2229_v34 }
  0x41   :  { %2423 = vmatpush3.msra.mxu1 %v1476_v14  ;;  %2397 = vmatprep.subr.mxu0 %v2228_v25 }
  0x42   :  { %2424 = vmatprep.subr.mxu1 %v1475_v43  ;;  %2398 = vmatpush3.msra.mxu0 %v2228_v25 }
  0x43   :  { %2425 = vmatpush3.msra.mxu1 %v1475_v43  ;;  %2399 = vmatprep.subr.mxu0 %v2227_v50 }
  0x44   :  { %2426 = vmatprep.subr.mxu1 %v1474_v44  ;;  %2400 = vmatpush3.msra.mxu0 %v2227_v50 }
  0x45   :  { %2427 = vmatpush3.msra.mxu1 %v1474_v44  ;;  %2401 = vmatprep.subr.mxu0 %v2226_v0 }
  0x46   :  { %2428 = vmatprep.subr.mxu1 %v1473_v46  ;;  %2402 = vmatpush3.msra.mxu0 %v2226_v0 }
  0x47   :  { %2429 = vmatpush3.msra.mxu1 %v1473_v46  ;;  %2403 = vmatprep.subr.mxu0 %v2225_v53 }
  0x48   :  { %2430 = vmatprep.subr.mxu1 %v1472_v47  ;;  %2404 = vmatpush3.msra.mxu0 %v2225_v53 }
  0x49   :  { %2431 = vmatpush3.msra.mxu1 %v1472_v47  ;;  %2405 = vmatprep.subr.mxu0 %v2224_v55 }
  0x4a   :  { %2432 = vmatprep.subr.mxu1 %v1471_v19  ;;  %2406 = vmatpush3.msra.mxu0 %v2224_v55 }
  0x4b   :  { %2433 = vmatpush3.msra.mxu1 %v1471_v19  ;;  %2407 = vmatprep.subr.mxu0 %v2223_v57 }
  0x4c   :  { %2434 = vmatprep.subr.mxu1 %v1470_v49  ;;  %2408 = vmatpush3.msra.mxu0 %v2223_v57 }
  0x4d   :  { %2435 = vmatpush3.msra.mxu1 %v1470_v49  ;;  %2409 = vmatprep.subr.mxu0 %v2222_v58 }
  0x4e   :  { %2436 = vmatprep.subr.mxu1 %v1469_v51  ;;  %2410 = vmatpush3.msra.mxu0 %v2222_v58 }
  0x4f   :  { %2437 = vmatpush3.msra.mxu1 %v1469_v51  ;;  %2411 = vmatprep.subr.mxu0 %v2221_v59 }
  0x50   :  { %2438 = vmatprep.subr.mxu1 %v1468_v52  ;;  %2412 = vmatpush3.msra.mxu0 %v2221_v59 }
  0x51   :  { %2439 = vmatpush3.msra.mxu1 %v1468_v52  ;;  %2413 = vmatprep.subr.mxu0 %v2220_v60 }
  0x52   :  { %2440 = vmatprep.subr.mxu1 %v1467_v54  ;;  %2414 = vmatpush3.msra.mxu0 %v2220_v60 }
  0x53   :  { %2441 = vmatpush3.msra.mxu1 %v1467_v54  ;;  %2449 = vmatprep.subr.mxu0 %v2905_v61 }
  0x54   :  { %2442 = vmatprep.subr.mxu1 %v1466_v56 }
  0x55   :  { %2443 = vmatpush3.msra.mxu1 %v1466_v56 }
  0x56   :  { %2444 = vmatprep.subr.mxu1 %v1465_v2 }
  0x57   :  { %2445 = vmatpush3.msra.mxu1 %v1465_v2 }
  0xe2   :  { %v2351_v62 = vpop.f32.mrf.mxu0 }
  0xe4   :  { %v393_v23 = vpop.f32.mrf.mxu0 }
  0xe5   :  { %v2358_v16 = vpop.f32.mrf.mxu1 }
  0xe6   :  { %v567_v3 = vadd.f32 %v2358_v16, %v2351_v62 }
  0xe7   :  { %v561_v63 = vpop.f32.mrf.mxu1 }
  0xe8   :  { %v562_v7 = vadd.f32 %v561_v63, %v393_v23 }
  0xf1   :  { %v2365_v5 = vpop.f32.mrf.mxu0  ;;  %v2372_v10 = vpop.f32.mrf.mxu1 }
  0xf2   :  { %v842_v9 = vadd.f32 %v2365_v5, %v567_v3 }
  0xf3   :  { %v832_v22 = vpop.f32.mrf.mxu0  ;;  %v1018_v28 = vpop.f32.mrf.mxu1 }
  0xf4   :  { %v851_v26 = vadd.f32 %v2210_v6, %v842_v9  ;;  %v841_v12 = vadd.f32 %v832_v22, %v562_v7 }
  0xf5   :  { %v2379_v17 = vpop.f32.mrf.mxu0 }
  0xf6   :  { %v853_v13 = vmax.f32 %v851_v26, 0.0  ;;  %v850_v15 = vadd.f32 %v2210_v6, %v841_v12  ;;  %v1099_v29 = vadd.f32 %v2379_v17, %v2372_v10 }
  0xf7   :  { %v1093_v41 = vpop.f32.mrf.mxu0 }
  0xf8   :  { %v905_v18 = vcombine.high %v853_v13, %v853_v13  ;;  %v912_v21 = vrot.slane %v853_v13, %v2649_v20  ;;  %v852_v27 = vmax.f32 %v850_v15, 0.0  ;;  %v1094_v44 = vadd.f32 %v1093_v41, %v1018_v28 }
  0xfa   :  { %v920_v31 = vcombine.high %v912_v21, %v912_v21  ;;  %v856_v32 = vcombine.high %v852_v27, %v852_v27  ;;  %v863_v33 = vrot.slane %v852_v27, %v2649_v20  ;;  %v2914_v35 = vrot.slane %v905_v18, %v2649_v20 }
  0xfb   :  { %v2917_v37 = vrot.slane %v912_v21, %v2649_v20 }
  0xfc   :  { %v2920_v38 = vrot.slane %v920_v31, %v2649_v20  ;;  %v2386_v1 = vpop.f32.mrf.mxu1  ;;  %v870_v11 = vrot.slane %v856_v32, %v2649_v20  ;;  %v871_v40 = vcombine.high %v863_v33, %v863_v33  ;;  %v879_v36 = vrot.slane %v863_v33, %v2649_v20 }
  0xfd   :  { %v1371_v30 = vadd.f32 %v2386_v1, %v1099_v29  ;;  %v2929_v24 = vrot.slane %v2914_v35, %v2649_v20  ;;  %v950_v43 = vcombine.high %v2917_v37, %v2917_v37 }
  0xfe   :  { %v951_v42 = vcombine.high %v2920_v38, %v2920_v38  ;;  %v872_v4 = vcombine.high %v870_v11, %v870_v11  ;;  %v893_v14 = vrot.slane %v871_v40, %v2649_v20  ;;  %v886_v45 = vrot.slane %v870_v11, %v2649_v20  ;;  %v1361_v50 = vpop.f32.mrf.mxu1 }
  0xff   :  { %v1373_v39 = vadd.f32 %v2210_v6, %v1371_v30  ;;  %v1696_v51 = vcombine.low %v2920_v38, %v950_v43  ;;  %v1370_v0 = vadd.f32 %v1361_v50, %v1094_v44  ;;  %v901_v9 = vcombine.high %v879_v36, %v879_v36 }
 0x100   :  { %v900_v46 = vrot.slane %v872_v4, %v2649_v20  ;;  %v1647_v48 = vcombine.low %v879_v36, %v893_v14  ;;  %v1697_v47 = vcombine.low %v951_v42, %v2929_v24  ;;  %v2237_v34 = vcombine.high %v879_v36, %v893_v14 }
 0x101   :  { %v1375_v49 = vmax.f32 %v1373_v39, 0.0  ;;  %v1372_v2 = vadd.f32 %v2210_v6, %v1370_v0  ;;  %v1704_v23 = vrot.slane %v1696_v51, %v2649_v20  ;;  %v902_v63 = vcombine.high %v886_v45, %v886_v45 }
 0x102   :  { %v904_v19 = vcombine.high %v900_v46, %v900_v46  ;;  %v1649_v25 = vcombine.low %v886_v45, %v900_v46  ;;  %v1657_v52 = vrot.slane %v1647_v48, %v2649_v20  ;;  %v1664_v53 = vrot.slane %v2237_v34, %v2649_v20 }
 0x103   :  { %v1433_v54 = vrot.slane %v1375_v49, %v2649_v20  ;;  %v1711_v56 = vrot.slane %v1697_v47, %v2649_v20  ;;  %v1426_v57 = vcombine.high %v1375_v49, %v1375_v49  ;;  %v1374_v16 = vmax.f32 %v1372_v2, 0.0 }
 0x104   :  { %v1650_v55 = vcombine.low %v904_v19, %v2917_v37  ;;  %v1671_v59 = vrot.slane %v1649_v25, %v2649_v20  ;;  %v1679_v62 = vcombine.low %v1657_v52, %v1664_v53  ;;  %v903_v3 = vcombine.high %v893_v14, %v893_v14 }
 0x105   :  { %v1441_v58 = vcombine.high %v1433_v54, %v1433_v54  ;;  %v1378_v22 = vcombine.high %v1374_v16, %v1374_v16  ;;  %v1385_v26 = vrot.slane %v1374_v16, %v2649_v20  ;;  %v1712_v10 = vcombine.low %v1704_v23, %v1711_v56  ;;  %v2252_v23 = vld [vmem:[%s3082_s3 + $0x140] sm:$0xff] }
 0x106   :  { %v1678_v60 = vrot.slane %v1650_v55, %v2649_v20  ;;  %v1440_v6 = vrot.slane %v1426_v57, %v2649_v20  ;;  %v1448_v12 = vrot.slane %v1433_v54, %v2649_v20  ;;  %v1687_v13 = vrot.slane %v1679_v62, %v2649_v20 }
 0x107   :  { %v1462_v5 = vrot.slane %v1441_v58, %v2649_v20  ;;  %v1392_v17 = vrot.slane %v1378_v22, %v2649_v20  ;;  %v1393_v18 = vcombine.high %v1385_v26, %v1385_v26  ;;  %v1815_v21 = vcombine.low %v903_v3, %v886_v45  ;;  %v2251_v3 = vld [vmem:[%s3082_s3 + $0x138] sm:$0xff] }
 0x108   :  { %v1680_v7 = vcombine.low %v1671_v59, %v1678_v60  ;;  %v1816_v29 = vcombine.low %v900_v46, %v902_v63  ;;  %v1401_v32 = vrot.slane %v1385_v26, %v2649_v20  ;;  %v1719_v1 = vrot.slane %v1712_v10, %v2649_v20  ;;  %v2247_v22 = vld [vmem:[%s3082_s3 + $0x118] sm:$0xff]  ;;  %v2245_v10 = vld [vmem:[%s3082_s3 + $0x108] sm:$0xff] }
 0x109   :  { %v1464_v27 = vcombine.high %v1462_v5, %v1462_v5  ;;  %v1394_v31 = vcombine.high %v1392_v17, %v1392_v17  ;;  %v1415_v33 = vrot.slane %v1393_v18, %v2649_v20  ;;  %v1817_v11 = vcombine.low %v2917_v37, %v2920_v38 }
 0x10a   :  { %v1694_v15 = vrot.slane %v1680_v7, %v2649_v20  ;;  %v1814_v40 = vcombine.low %v893_v14, %v901_v9  ;;  %v1455_v30 = vrot.slane %v1440_v6, %v2649_v20  ;;  %v1463_v41 = vcombine.high %v1448_v12, %v1448_v12  ;;  %v2249_v7 = vld [vmem:[%s3082_s3 + $0x128] sm:$0xff]  ;;  %v2248_v9 = vld [vmem:[%s3082_s3 + $0x120] sm:$0xff] }
 0x10b   :  { %v1408_v42 = vrot.slane %v1392_v17, %v2649_v20  ;;  %v1422_v4 = vrot.slane %v1394_v31, %v2649_v20  ;;  %v1494_v36 = vcombine.low %v1401_v32, %v1415_v33  ;;  %v2234_v43 = vcombine.high %v1401_v32, %v1415_v33  ;;  %v2065_v31 = vld [vmem:[%s3084_s5 + $0x50] sm:$0xff]  ;;  %v2064_v32 = vld [vmem:[%s3084_s5 + $0x48] sm:$0xff]  ;;  %v2063_v33 = vld [vmem:[%s3084_s5 + $0x40] sm:$0xff] }
 0x10c   :  { %v1695_v28 = vcombine.low %v1687_v13, %v1694_v15  ;;  %v1544_v39 = vcombine.low %v1464_v27, %v1455_v30  ;;  %v1831_v44 = vrot.slane %v1815_v21, %v2649_v20  ;;  %v1838_v45 = vrot.slane %v1816_v29, %v2649_v20  ;;  %v2243_v15 = vld [vmem:[%s3082_s3 + $0xf8] sm:$0xff]  ;;  %v2240_v21 = vld [vmem:[%s3082_s3 + $0xe0] sm:$0xff] }
 0x10d   :  { %v1425_v46 = vcombine.high %v1422_v4, %v1422_v4  ;;  %v1496_v14 = vcombine.low %v1408_v42, %v1422_v4  ;;  %v1504_v48 = vrot.slane %v1494_v36, %v2649_v20  ;;  %v1511_v47 = vrot.slane %v2234_v43, %v2649_v20  ;;  %v2066_v29 = vld [vmem:[%s3084_s5 + $0x58] sm:$0xff]  ;;  %v2059_v30 = vld [vmem:[%s3084_s5 + $0x20] sm:$0xff]  ;;  %v2057_v42 = vld [vmem:[%s3084_s5 + $0x10] sm:$0xff] }
 0x10e   :  { %2446 = vmatprep.mubr.msk.f32.mxu1 %vm1567_vm1, %v1695_v28  ;;  %v1543_v34 = vcombine.low %v1462_v5, %v1463_v41  ;;  %v1824_v19 = vrot.slane %v1814_v40, %v2649_v20  ;;  %v1845_v49 = vrot.slane %v1817_v11, %v2649_v20  ;;  %v1558_v50 = vrot.slane %v1544_v39, %v2649_v20  ;;  %v2250_v5 = vld [vmem:[%s3082_s3 + $0x130] sm:$0xff]  ;;  %v2060_v40 = vld [vmem:[%s3084_s5 + $0x28] sm:$0xff]  ;;  %v2058_v41 = vld [vmem:[%s3084_s5 + $0x18] sm:$0xff] }
 0x10f   :  { %2447 = vmatmul.mubr.msk.f32.vlgmr.msra.gmra.mxu1 %vm1567_vm1, %v1719_v1  ;;  %v1497_v25 = vcombine.low %v1425_v46, %v1448_v12  ;;  %v1518_v0 = vrot.slane %v1496_v14, %v2649_v20  ;;  %v1526_v53 = vcombine.low %v1504_v48, %v1511_v47  ;;  %v2244_v12 = vld [vmem:[%s3082_s3 + $0x100] sm:$0xff]  ;;  %v2254_v13 = vcombine.high %v2917_v37, %v2920_v38  ;;  %v2241_v37 = vld [vmem:[%s3082_s3 + $0xe8] sm:$0xff]  ;;  %v2062_v1 = vld [vmem:[%s3084_s5 + $0x38] sm:$0xff] }
 0x110   :  { %v1846_v51 = vcombine.low %v1824_v19, %v1831_v44  ;;  %v1847_v54 = vcombine.low %v1838_v45, %v1845_v49  ;;  %v1551_v55 = vrot.slane %v1543_v34, %v2649_v20  ;;  %v2545_v28 = vmov 0.0   ;;  %v2061_v11 = vld [vmem:[%s3084_s5 + $0x30] sm:$0xff]  ;;  %v2056_v4 = vld [vmem:[%s3084_s5 + $0x8] sm:$0xff]  ;;  %v2055_v36 = vld [vmem:[%s3084_s5] sm:$0xff] }
 0x111   :  { %v1525_v52 = vrot.slane %v1497_v25, %v2649_v20  ;;  %v1534_v2 = vrot.slane %v1526_v53, %v2649_v20  ;;  %v1871_v18 = vrot.slane %v2254_v13, %v2649_v20  ;;  %2480 = vmatprep.subr.mxu1 %v2545_v28  ;;  %2504 = vmatprep.mubr.msk.f32.mxu1 %vm2546_vm2, %v2545_v28  ;;  %v2547_v44 = vmov 1983009808   ;;  %v2257_v34 = vld [vmem:[%s3083_s4] ss:$0 sm:$0xff] }
 0x112   :  { %v1559_v57 = vcombine.low %v1551_v55, %v1558_v50  ;;  %v1854_v59 = vrot.slane %v1846_v51, %v2649_v20  ;;  %v1861_v60 = vrot.slane %v1847_v54, %v2649_v20  ;;  %2481 = vmatpush3.msra.mxu1 %v2066_v29  ;;  %v1983_v45 = vunpack.c.l.s4 %v2547_v44 }
 0x113   :  { %v1527_v56 = vcombine.low %v1518_v0, %v1525_v52  ;;  %2482 = vmatprep.subr.mxu1 %v2545_v28 }
 0x114   :  { %v1566_v16 = vrot.slane %v1559_v57, %v2649_v20  ;;  %v1862_v63 = vcombine.low %v1854_v59, %v1861_v60  ;;  %2483 = vmatpush3.msra.mxu1 %v2065_v31  ;;  %v1984_v49 = vunpack.c.0.s8 %v1983_v45 }
 0x115   :  { %v1541_v58 = vrot.slane %v1527_v56, %v2649_v20  ;;  %2484 = vmatprep.subr.mxu1 %v2545_v28 }
 0x116   :  { %2485 = vmatpush3.msra.mxu1 %v2064_v32  ;;  %v1987_v53 = vsub.s32 %v1984_v49, %v2618_v8 }
 0x117   :  { %v1542_v62 = vcombine.low %v1534_v2, %v1541_v58  ;;  %2486 = vmatprep.subr.mxu1 %v2545_v28 }
 0x118   :  { %2487 = vmatpush3.msra.mxu1 %v2063_v33 }
 0x119   :  { %2415 = vmatprep.mubr.msk.f32.mxu0 %vm1567_vm1, %v1542_v62  ;;  %2488 = vmatprep.subr.mxu1 %v2545_v28 }
 0x11a   :  { %2416 = vmatmul.mubr.msk.f32.vlgmr.msra.gmra.mxu0 %vm1567_vm1, %v1566_v16  ;;  %2489 = vmatpush3.msra.mxu1 %v2062_v1 }
 0x11b   :  { %2450 = vmatpush3.msra.mxu0 %v2905_v61  ;;  %2477 = vmatprep.mubr.msk.f32.mxu0 %vm1567_vm1, %v1862_v63  ;;  %v921_v61 = vcombine.high %v2914_v35, %v2914_v35  ;;  %v2246_v35 = vld [vmem:[%s3082_s3 + $0x110] sm:$0xff] }
 0x11c   :  { %2451 = vmatprep.subr.mxu0 %v2252_v23  ;;  %2490 = vmatprep.subr.mxu1 %v2545_v28 }
 0x11d   :  { %2452 = vmatpush3.msra.mxu0 %v2252_v23  ;;  %v949_v26 = vrot.slane %v921_v61, %v2649_v20  ;;  %2491 = vmatpush3.msra.mxu1 %v2061_v11 }
 0x11e   :  { %2453 = vmatprep.subr.mxu0 %v2251_v3  ;;  %2492 = vmatprep.subr.mxu1 %v2545_v28 }
 0x11f   :  { %2454 = vmatpush3.msra.mxu0 %v2251_v3  ;;  %v1864_v6 = vcombine.low %v2929_v24, %v949_v26  ;;  %v2242_v24 = vld [vmem:[%s3082_s3 + $0xf0] sm:$0xff]  ;;  %2493 = vmatpush3.msra.mxu1 %v2060_v40 }
 0x120   :  { %2455 = vmatprep.subr.mxu0 %v2250_v5  ;;  %2494 = vmatprep.subr.mxu1 %v2545_v28 }
 0x121   :  { %2456 = vmatpush3.msra.mxu0 %v2250_v5  ;;  %v1878_v17 = vrot.slane %v1864_v6, %v2649_v20  ;;  %2495 = vmatpush3.msra.mxu1 %v2059_v30 }
 0x122   :  { %2457 = vmatprep.subr.mxu0 %v2249_v7  ;;  %2496 = vmatprep.subr.mxu1 %v2545_v28 }
 0x123   :  { %2458 = vmatpush3.msra.mxu0 %v2249_v7  ;;  %v1879_v38 = vcombine.low %v1871_v18, %v1878_v17  ;;  %2497 = vmatpush3.msra.mxu1 %v2058_v41 }
 0x124   :  { %2459 = vmatprep.subr.mxu0 %v2248_v9  ;;  %2498 = vmatprep.subr.mxu1 %v2545_v28 }
 0x125   :  { %2460 = vmatpush3.msra.mxu0 %v2248_v9  ;;  %v1886_v27 = vrot.slane %v1879_v38, %v2649_v20  ;;  %2499 = vmatpush3.msra.mxu1 %v2057_v42 }
 0x126   :  { %2461 = vmatprep.subr.mxu0 %v2247_v22  ;;  %2500 = vmatprep.subr.mxu1 %v2545_v28 }
 0x127   :  { %2462 = vmatpush3.msra.mxu0 %v2247_v22  ;;  %2501 = vmatpush3.msra.mxu1 %v2056_v4 }
 0x128   :  { %2463 = vmatprep.subr.mxu0 %v2246_v35  ;;  %2502 = vmatprep.subr.mxu1 %v2545_v28 }
 0x129   :  { %2464 = vmatpush3.msra.mxu0 %v2246_v35  ;;  %2503 = vmatpush3.msra.mxu1 %v2055_v36 }
 0x12a   :  { %2465 = vmatprep.subr.mxu0 %v2245_v10 }
 0x12b   :  { %2466 = vmatpush3.msra.mxu0 %v2245_v10 }
 0x12c   :  { %2467 = vmatprep.subr.mxu0 %v2244_v12 }
 0x12d   :  { %2468 = vmatpush3.msra.mxu0 %v2244_v12 }
 0x12e   :  { %2469 = vmatprep.subr.mxu0 %v2243_v15 }
 0x12f   :  { %2470 = vmatpush3.msra.mxu0 %v2243_v15 }
 0x130   :  { %2471 = vmatprep.subr.mxu0 %v2242_v24 }
 0x131   :  { %2472 = vmatpush3.msra.mxu0 %v2242_v24 }
 0x132   :  { %2473 = vmatprep.subr.mxu0 %v2241_v37 }
 0x133   :  { %2474 = vmatpush3.msra.mxu0 %v2241_v37 }
 0x134   :  { %2475 = vmatprep.subr.mxu0 %v2240_v21 }
 0x135   :  { %2476 = vmatpush3.msra.mxu0 %v2240_v21 }
 0x136   :  { %2478 = vmatmul.mubr.msk.f32.vlgmr.msra.gmra.mxu0 %vm1567_vm1, %v1886_v27  ;;  %v2258_v27 = vld [vmem:[%s3085_s6] ss:$0 sm:$0xff] }
 0x1cf   :  { %v2448_v39 = vpop.f32.mrf.mxu1 }
 0x1d1   :  { %v1790_v48 = vpop.f32.mrf.mxu1 }
 0x1da   :  { %v2417_v43 = vpop.f32.mrf.mxu0 }
 0x1db   :  { %v1796_v14 = vadd.f32 %v2448_v39, %v2417_v43 }
 0x1dc   :  { %v1638_v46 = vpop.f32.mrf.mxu0 }
 0x1dd   :  { %v1791_v19 = vadd.f32 %v1790_v48, %v1638_v46 }
 0x1f6   :  { %v2479_v47 = vpop.f32.mrf.mxu0 }
 0x1f7   :  { %v1967_v25 = vadd.f32 %v2479_v47, %v1796_v14 }
 0x1f8   :  { %v1957_v50 = vpop.f32.mrf.mxu0 }
 0x1f9   :  { %v1976_v51 = vadd.f32 %v2257_v34, %v1967_v25  ;;  %v1966_v0 = vadd.f32 %v1957_v50, %v1791_v19 }
 0x1fb   :  { %v1978_v52 = vmax.f32 %v1976_v51, 0.0  ;;  %v1975_v54 = vadd.f32 %v2257_v34, %v1966_v0 }
 0x1fd   :  { %v1977_v55 = vmax.f32 %v1975_v54, 0.0  ;;  %v2004_v56 = vrot.slane %v1978_v52, %v1987_v53 }
 0x1ff   :  { %v1981_v57 = vcombine.high %v1977_v55, %v1977_v55  ;;  %v1988_v2 = vrot.slane %v1977_v55, %v1987_v53  ;;  %v2005_v60 = vcombine.high %v2004_v56, %v2004_v56 }
 0x201   :  { %v1995_v58 = vrot.slane %v1981_v57, %v1987_v53  ;;  %v1996_v59 = vcombine.high %v1988_v2, %v1988_v2  ;;  %v2036_v5 = vrot.slane %v2005_v60, %v1987_v53 }
 0x203   :  { %v1997_v62 = vcombine.high %v1995_v58, %v1995_v58  ;;  %v2006_v16 = vcombine.low %v1988_v2, %v1996_v59  ;;  %v2020_v63 = vrot.slane %v1995_v58, %v1987_v53 }
 0x205   :  { %v2013_v23 = vrot.slane %v2006_v16, %v1987_v53  ;;  %v2022_v3 = vcombine.low %v1997_v62, %v2004_v56 }
 0x207   :  { %v2021_v7 = vcombine.low %v2013_v23, %v2020_v63  ;;  %v2029_v61 = vrot.slane %v2022_v3, %v1987_v53 }
 0x209   :  { %v2037_v9 = vcombine.low %v2029_v61, %v2036_v5  ;;  %v2041_v22 = vsel %vm2040_vm3, %v2021_v7, 0.0 }
 0x20a   :  { %v2042_v8 = vrot.slane %v2041_v22, 4 }
 0x20b   :  { %v2048_v26 = vsel %vm2040_vm3, %v2037_v9, 0.0 }
 0x20c   :  { %v2043_v35 = vadd.f32 %v2042_v8, %v2041_v22  ;;  %v2049_v10 = vrot.slane %v2048_v26, 4 }
 0x20e   :  { %v2044_v6 = vrot.slane %v2043_v35, 2  ;;  %v2050_v12 = vadd.f32 %v2049_v10, %v2048_v26 }
 0x210   :  { %v2045_v13 = vadd.f32 %v2044_v6, %v2043_v35  ;;  %v2051_v15 = vrot.slane %v2050_v12, 2 }
 0x212   :  { %v2046_v17 = vrot.slane %v2045_v13, 1  ;;  %v2052_v24 = vadd.f32 %v2051_v15, %v2050_v12 }
 0x214   :  { %v2053_v18 = vrot.slane %v2052_v24, 1  ;;  %v2047_v37 = vadd.f32 %v2046_v17, %v2045_v13 }
 0x216   :  { %v2054_v38 = vadd.f32 %v2053_v18, %v2052_v24 }
 0x218   :  { %v2077_v21 = vsel %vm2076_vm4, %v2054_v38, %v2047_v37 }
 0x219   :  { %2505 = vmatmul.mubr.msk.f32.vlgmr.msra.gmra.mxu1 %vm2078_vm5, %v2077_v21 }
 0x2d9   :  { %v2147_v28 = vpop.f32.mrf.mxu1 }
 0x2da   :  { %v2148_v29 = vadd.f32 %v2258_v27, %v2147_v28 }
 0x2db   :  { %v2506_v31 = vpop.f32.mrf.mxu1 }
 0x2dc   :  { %v2158_v32 = vrot.slane %v2148_v29, %v2649_v20 }
 0x2de   :  { %v2159_v33 = vcombine.high %v2158_v32, %v2158_v32  ;;  %v2166_v1 = vrot.slane %v2158_v32, %v2649_v20 }
 0x2e0   :  { %v2173_v11 = vrot.slane %v2159_v33, %v2649_v20  ;;  %2177 = vst.msk [vmem:[#allocation2] sm:$0x1] %vm2176_vm6, %v2166_v1 }
 0x2e2   :  { %2178 = vst.msk [vmem:[#allocation2 + $0x1] sm:$0x1] %vm2176_vm6, %v2173_v11 }
 0x2e3   :  { %2533 = shalt.err (!%p2530_p4)
}
 0x2e4   :  { %s2549_s6 = smov 16   ;;  %s2550_s15 = smov 1  }
 0x2e5   :  { %2190 = dma.vmem_to_hbm [thread:$0]  %s2185_s2, 32, %s3086_s7, [#allocation3], %s2549_s6, %s2549_s6, %s2550_s15  }
 0x2e6   :  { %2542 = dma.done.wait [#allocation3], 32  }
 0x2e7   :  { %2543 = vsyncadd [#allocation3], 4294967264 }
 0x2e8   :  { %2194 = vsyncpa [#allocation3], 1 }

</bundles_post_ra>
